<compile_context>
chip_gen: v6e
topology: v6e:2x2x1
jax: 0.10.0
libtpu: 0.0.40
codegen_flags: <defaults>
</compile_context>

<pallas_src>
import jax
import jax.numpy as jnp
from jax.experimental import pallas as pl
from jax.experimental.pallas import tpu as pltpu


def _linear_relu_kernel(x_ref, w_ref, b_ref, o_ref):
    """o = relu(x @ w + b);  x:[tb,in_f], w:[in_f,out_f], b:[1,out_f]."""
    y = jnp.dot(x_ref[...], w_ref[...], preferred_element_type=jnp.float32)
    y = y + b_ref[...]                       # VPU f32, broadcast [1, out_f]
    o_ref[...] = jnp.maximum(y, 0.0).astype(o_ref.dtype)


def prepare_params(weight, bias):
    """One-time parameter prep (init time, NOT per forward call).

    weight: [out_f, in_f] (torch Linear convention), bias: [out_f].
    Returns w_t: [in_f, out_f] (MXU-native, plain x @ w), b: [1, out_f].
    """
    w_t = jnp.asarray(weight, jnp.float32).T                 # [in_f, out_f]
    b = jnp.asarray(bias, jnp.float32).reshape(1, -1)        # [1, out_f]
    return w_t, b


def _vmem_bytes_estimate(rows, in_f, out_f):
    """Rough VMEM footprint of the gridless whole-array path (f32, lane/sublane padded)."""
    def padded(r, c):
        return ((r + 7) // 8) * 8 * ((c + 127) // 128) * 128 * 4
    # x + out (single-buffered, no grid) + weight + bias.
    return padded(rows, in_f) + padded(rows, out_f) + padded(in_f, out_f) + padded(1, out_f)


def toy_model_forward(x, w_t, b, *, batch_tile=2048):
    """Equivalent of torch: relu(x @ weight.T + bias), params from prepare_params."""
    B, in_f = x.shape
    out_f = w_t.shape[1]
    out_shape = jax.ShapeDtypeStruct((B, out_f), jnp.float32)

    cost = pl.CostEstimate(
        flops=2 * B * in_f * out_f,
        transcendentals=0,
        bytes_accessed=4 * (B * in_f + B * out_f + in_f * out_f + out_f),
    )

    # Small-batch path: whole problem fits comfortably in VMEM — no grid, no
    # pipelining machinery.  Gated on an explicit byte estimate (8 MiB budget
    # is safe under v5e's 16 MiB scoped default and well under v7x physical).
    if B <= batch_tile and _vmem_bytes_estimate(B, in_f, out_f) <= 8 * 1024 * 1024:
        vmem = pltpu.MemorySpace.VMEM
        return pl.pallas_call(
            _linear_relu_kernel,
            out_shape=out_shape,
            in_specs=[pl.BlockSpec(memory_space=vmem)] * 3,
            out_specs=pl.BlockSpec(memory_space=vmem),
            cost_estimate=cost,
        )(x, w_t, b)

    # Batch-tiled path: cdiv grid covers every batch size (ragged tail block is
    # masked by Pallas); weight/bias blocks map to (0,0) every step so they
    # stay resident in VMEM across iterations.
    grid = (pl.cdiv(B, batch_tile),)
    return pl.pallas_call(
        _linear_relu_kernel,
        out_shape=out_shape,
        grid=grid,
        in_specs=[
            pl.BlockSpec((batch_tile, in_f), lambda i: (i, 0)),
            pl.BlockSpec((in_f, out_f), lambda i: (0, 0)),
            pl.BlockSpec((1, out_f), lambda i: (0, 0)),
        ],
        out_specs=pl.BlockSpec((batch_tile, out_f), lambda i: (i, 0)),
        compiler_params=pltpu.CompilerParams(
            dimension_semantics=("parallel",),
            vmem_limit_bytes=32 * 1024 * 1024,
        ),
        cost_estimate=cost,
    )(x, w_t, b)


if __name__ == "__main__":
    key = jax.random.PRNGKey(0)
    kx, kw, kb, kx2 = jax.random.split(key, 4)

    B, IN, OUT = 8, 10, 10
    x = jax.random.normal(kx, (B, IN), dtype=jnp.float32)
    # Deterministic "Linear(10, 10)" parameters (torch convention: weight [out, in]).
    weight = jax.random.normal(kw, (OUT, IN), dtype=jnp.float32) * 0.1
    bias = jax.random.normal(kb, (OUT,), dtype=jnp.float32) * 0.1

    # One-time parameter prep: transpose to MXU-native [in, out].
    w_t, b_vec = prepare_params(weight, bias)

    # Small-batch (gridless) path.
    out = jax.block_until_ready(toy_model_forward(x, w_t, b_vec))
    ref = jnp.maximum(x @ weight.T + bias, 0.0)
    assert out.shape == (B, OUT)
    assert jnp.allclose(out, ref, atol=1e-5, rtol=1e-5)

    # Batch-tiled (cdiv grid) path, exercised with a larger batch that is NOT a
    # multiple of batch_tile (ragged tail block).
    B2 = 2560
    x2 = jax.random.normal(kx2, (B2, IN), dtype=jnp.float32)
    out2 = jax.block_until_ready(toy_model_forward(x2, w_t, b_vec))
    ref2 = jnp.maximum(x2 @ weight.T + bias, 0.0)
    assert out2.shape == (B2, OUT)
    assert jnp.allclose(out2, ref2, atol=1e-5, rtol=1e-5)

    print("KERNEL_OK")
</pallas_src>

<mosaic_0001>
module attributes {stable_mosaic.version = 11 : i64} {
  func.func @_linear_relu_kernel(%arg0: memref<8x10xf32, #tpu.memory_space<vmem>>, %arg1: memref<10x10xf32, #tpu.memory_space<vmem>>, %arg2: memref<1x10xf32, #tpu.memory_space<vmem>>, %arg3: memref<8x10xf32, #tpu.memory_space<vmem>>) attributes {dimension_semantics = [], scalar_prefetch = 0 : i64, scratch_operands = 0 : i64, tpu.core_type = #tpu.core_type<tc>} {
    %c0 = arith.constant 0 : index
    %c0_0 = arith.constant 0 : index
    %0 = vector.load %arg0[%c0, %c0_0] : memref<8x10xf32, #tpu.memory_space<vmem>>, vector<8x10xf32>
    %c0_1 = arith.constant 0 : index
    %c0_2 = arith.constant 0 : index
    %1 = vector.load %arg1[%c0_1, %c0_2] : memref<10x10xf32, #tpu.memory_space<vmem>>, vector<10x10xf32>
    %cst = arith.constant dense<0.000000e+00> : vector<8x10xf32>
    %2 = tpu.matmul %0, %1, %cst {dimension_numbers = #tpu.dot_dimension_numbers<[1], [0], [0], [1], [0, 0, 1, 1], [], []>} : vector<8x10xf32>, vector<10x10xf32>, vector<8x10xf32> -> vector<8x10xf32>
    %c0_3 = arith.constant 0 : index
    %c0_4 = arith.constant 0 : index
    %3 = vector.load %arg2[%c0_3, %c0_4] : memref<1x10xf32, #tpu.memory_space<vmem>>, vector<1x10xf32>
    %4 = vector.broadcast %3 : vector<1x10xf32> to vector<8x10xf32>
    %5 = arith.addf %2, %4 : vector<8x10xf32>
    %cst_5 = arith.constant 0.000000e+00 : f32
    %6 = vector.broadcast %cst_5 : f32 to vector<8x10xf32>
    %7 = arith.maximumf %5, %6 : vector<8x10xf32>
    %c0_6 = arith.constant 0 : index
    %c0_7 = arith.constant 0 : index
    %8 = vector.load %arg3[%c0_6, %c0_7] : memref<8x10xf32, #tpu.memory_space<vmem>>, vector<8x10xf32>
    tpu.vector_store %arg3[%c0_6, %c0_7], %7 {strides = array<i32>} : memref<8x10xf32, #tpu.memory_space<vmem>>, vector<8x10xf32>,
    return
  }
}

</mosaic_0001>

<bundles_post_ra>
// kernel: tpu_custom_call.1
= control target key start
LH: loop header
LB: loop body
LE: loop exit
PB: predicated region body
PF: predicated region fallthrough
CT: control target
= control target key end

     0   :  { %8 = vsyncpa [#allocation3], 0  ;;  %s272_s0 = inlined_call_operand.hbm [shape: f32[8,10], index: 0, kind: input, shape index: {}]   ;;  %s273_s1 = inlined_call_operand.hbm [shape: f32[10,10], index: 1, kind: input, shape index: {}]   ;;  %s274_s2 = inlined_call_operand.vmem [shape: f32[1,10], index: 2, kind: input, shape index: {}]   ;;  %s275_s3 = inlined_call_operand.hbm [shape: f32[8,10], index: 3, kind: output, shape index: {}]  }
   0x1   :  { %9 = vsyncpa [#allocation6], 0 }
   0x2   :  { %10 = vsyncpa [#allocation4], 0  ;;  %s233_s12 = smov [#allocation2]   ;;  %s234_s14 = smov [#allocation5]  }
   0x3   :  { %s17_s13 = sshll.u32 %s233_s12, 4  ;;  %s26_s15 = sshll.u32 %s234_s14, 4  ;;  %s18_s13 = int_to_ptr.vmem [resolvable:$true] %s17_s13  ;;  %s27_s15 = int_to_ptr.vmem [resolvable:$true] %s26_s15 }
   0x4   :  { %s175_s16 = scalar_lea.vmem %s18_s13, 128  ;;  %p180_p1 = scmp.lt.s32.totalorder %s18_s13, %s18_s13 }
   0x5   :  { %p176_p0 = scmp.ne.s32.totalorder %s18_s13, %s175_s16  ;;  %p181_p2 = scmp.lt.s32.totalorder %s175_s16, %s175_s16 }
   0x7   :  { %p182_p3 = por %p181_p2, %p180_p1 }
   0x9   :  { %p183_p4 = pnand %p182_p3, %p176_p0 }
   0xb   :  { %186 = shalt.err (!%p183_p4)
}
   0xc   :  { %20 = dma.hbm_to_vmem [thread:$0]  %s272_s0, 128, %s18_s13, [#allocation3]  }
   0xd   :  { %s195_s19 = scalar_lea.vmem %s27_s15, 256  ;;  %p200_p6 = scmp.lt.s32.totalorder %s27_s15, %s27_s15 }
   0xe   :  { %p196_p5 = scmp.ne.s32.totalorder %s27_s15, %s195_s19  ;;  %p201_p7 = scmp.lt.s32.totalorder %s195_s19, %s195_s19 }
  0x10   :  { %p202_p8 = por %p201_p7, %p200_p6 }
  0x12   :  { %p203_p9 = pnand %p202_p8, %p196_p5 }
  0x14   :  { %206 = shalt.err (!%p203_p9)
}
  0x15   :  { %s235_s20 = smov 128   ;;  %s236_s21 = smov 8  }
  0x16   :  { %32 = dma.hbm_to_vmem [thread:$0]  %s273_s1, 256, %s27_s15, [#allocation6], %s235_s20, %s235_s20, %s236_s21  }
  0x17   :  { %227 = dma.done.wait [#allocation3], 128  }
  0x18   :  { %228 = vsyncadd [#allocation3], 4294967168 }
  0x19   :  { %229 = dma.done.wait [#allocation6], 256  }
  0x1a   :  { %230 = vsyncadd [#allocation6], 4294967040  ;;  %v237_v0 = vmov 0.0   ;;  %vm238_vm0 = vmmov 0   ;;  %vm55_vm1 = vcmask 1041408   ;;  %v42_v2 = vld [vmem:[#allocation5] sm:$0xff] }
  0x1b   :  { %153 = vmatprep.subr.mxu0 %v237_v0  ;;  %157 = vmatprep.mubr.msk.f32.mxu0 %vm238_vm0, %v237_v0  ;;  %v43_v1 = vld [vmem:[#allocation5 + $0x8] sm:$0x3]  ;;  %v41_v3 = vld [vmem:[#allocation2] sm:$0xff]  ;;  %vm51_vm2 = vcmask 80896   ;;  %s239_s1 = smov [#allocation7]  }
  0x1c   :  { %154 = vmatpush3.msk.msra.mxu0 %vm55_vm1, %v43_v1  ;;  %v147_v4 = vld [vmem:[%s274_s2] ss:$0 sm:$0xff]  ;;  %s137_s25 = sshll.u32 %s239_s1, 4  ;;  %s138_s25 = int_to_ptr.vmem [resolvable:$true] %s137_s25 }
  0x1d   :  { %155 = vmatprep.subr.mxu0 %v237_v0  ;;  %s207_s26 = scalar_lea.vmem %s138_s25, 128  ;;  %p212_p11 = scmp.lt.s32.totalorder %s138_s25, %s138_s25 }
  0x1e   :  { %156 = vmatpush3.msra.mxu0 %v42_v2  ;;  %p208_p10 = scmp.ne.s32.totalorder %s138_s25, %s207_s26  ;;  %p213_p12 = scmp.lt.s32.totalorder %s207_s26, %s207_s26 }
  0x1f   :  { %158 = vmatmul.mubr.msk.f32.vlgmr.msra.gmra.mxu0 %vm51_vm2, %v41_v3 }
  0x20   :  { %p214_p13 = por %p213_p12, %p212_p11 }
  0x22   :  { %p215_p0 = pnand %p214_p13, %p208_p10 }
  0xdf   :  { %v125_v5 = vpop.f32.mrf.mxu0 }
  0xe0   :  { %v126_v6 = vadd.f32 %v147_v4, %v125_v5 }
  0xe1   :  { %v159_v7 = vpop.f32.mrf.mxu0 }
  0xe2   :  { %v129_v8 = vmax.f32 %v126_v6, 0.0 }
  0xe4   :  { %130 = vst.msk [vmem:[#allocation7] sm:$0xff] %vm51_vm2, %v129_v8 }
  0xe5   :  { %218 = shalt.err (!%p215_p0)
}
  0xe6   :  { %140 = dma.vmem_to_hbm [thread:$0]  %s138_s25, 128, %s275_s3, [#allocation4]  }
  0xe7   :  { %231 = dma.done.wait [#allocation4], 128  }
  0xe8   :  { %232 = vsyncadd [#allocation4], 4294967168 }
  0xe9   :  { %144 = vsyncpa [#allocation3], 1 }
  0xea   :  { %145 = vsyncpa [#allocation6], 1 }
  0xeb   :  { %146 = vsyncpa [#allocation4], 1 }

</bundles_post_ra>
